<compile_context>
chip_gen: v7x
topology: tpu7x:2x2x1
jax: 0.10.0
libtpu: 0.0.40
codegen_flags: <defaults>
</compile_context>

<pallas_src>
import functools

import jax
import jax.numpy as jnp
from jax.experimental import pallas as pl
from jax.experimental.pallas import tpu as pltpu

_SMOOTH = 1e-5
_LANES = 128
_X_TILE_BUDGET_BYTES = 2 * 1024 * 1024   # per-pipeline-buffer budget for the score tile


def _dice_partial_kernel(x_ref, t_ref, o_i_ref, o_y_ref, o_z_ref, *,
                         hw, n_classes, tile_len, do_softmax, need_mask):
    """One grid step: batch item b (axis 0), pixel tile j (axis 1).

    x_ref: (C, tile_len) scores, t_ref: (1, tile_len) int labels.
    Emits per-class partial sums for this tile: (C, 1) each.
    """
    j = pl.program_id(1)

    score = x_ref[...].astype(jnp.float32)                       # (C, tile_len)

    if do_softmax:
        # Numerically-stable softmax over the class (sublane) axis, fused here
        # so the wrapper never materialises the probabilities in HBM.
        m = jnp.max(score, axis=0, keepdims=True)
        e = jnp.exp(score - m)
        score = e / jnp.sum(e, axis=0, keepdims=True)

    labels = t_ref[...]                                          # (1, tile_len)
    cls = jax.lax.broadcasted_iota(jnp.int32, (n_classes, tile_len), 0)
    hit = labels == cls                                          # (C, tile_len)

    if need_mask:
        # Mask out the ragged tail of the last tile (stale VMEM beyond H*W).
        pos = jax.lax.broadcasted_iota(jnp.int32, (1, tile_len), 1)
        valid = (pos + j * tile_len) < hw                        # (1, tile_len)
        score = jnp.where(valid, score, 0.0)
        hit = jnp.logical_and(hit, valid)

    onehot = hit.astype(jnp.float32)

    # Lane-axis reductions (VPU folds + one XLU cross-lane reduce per sum).
    o_i_ref[...] = jnp.sum(score * onehot, axis=1, keepdims=True)   # intersect
    o_y_ref[...] = jnp.sum(onehot, axis=1, keepdims=True)           # y_sum
    o_z_ref[...] = jnp.sum(score * score, axis=1, keepdims=True)    # z_sum


def dice_loss(inputs, target, weight=None, softmax=False, *, max_tile_len=None):
    """Pallas implementation of DiceLoss.forward.

    inputs: [B, C, H, W] per-class scores (any float dtype)
    target: [B, 1, H, W] integer class labels
    """
    B, C, H, W = inputs.shape
    assert target.shape == (B, 1, H, W), "predict & target shape do not match"
    hw = H * W

    if weight is None:
        weight = [1.0] * C
    w = jnp.asarray(weight, dtype=jnp.float32)

    # Free reshapes (merge of contiguous trailing dims) — no HBM copies.
    x = inputs.reshape(B, C, hw)
    t = target.reshape(B, 1, hw).astype(jnp.int32)

    # Pixel-tile length: multiple of 128 lanes, sized to a modest VMEM budget
    # so the (C, tile_len) score tile double-buffers comfortably everywhere
    # (v5e/v6e/v7x default scoped VMEM limits).
    itemsize = inputs.dtype.itemsize
    budget_len = max(_LANES,
                     (_X_TILE_BUDGET_BYTES // (C * itemsize)) // _LANES * _LANES)
    if max_tile_len is not None:
        budget_len = min(budget_len, max(_LANES, (max_tile_len // _LANES) * _LANES))
    hw_up = pl.cdiv(hw, _LANES) * _LANES
    tile_len = min(hw_up, budget_len)
    num_tiles = pl.cdiv(hw, tile_len)
    need_mask = (hw % tile_len) != 0

    kernel = functools.partial(
        _dice_partial_kernel,
        hw=hw, n_classes=C, tile_len=tile_len,
        do_softmax=bool(softmax), need_mask=need_mask)

    part_shape = jax.ShapeDtypeStruct((B, num_tiles, C, 1), jnp.float32)
    out_spec = pl.BlockSpec((pl.Squeezed(), pl.Squeezed(), C, 1),
                            lambda b, j: (b, j, 0, 0))

    intersect, y_sum, z_sum = pl.pallas_call(
        kernel,
        out_shape=(part_shape, part_shape, part_shape),
        grid=(B, num_tiles),
        in_specs=[
            # all classes of pixel tile j of batch item b
            pl.BlockSpec((pl.Squeezed(), C, tile_len), lambda b, j: (b, 0, j)),
            # the matching label tile (read exactly once)
            pl.BlockSpec((pl.Squeezed(), 1, tile_len), lambda b, j: (b, 0, j)),
        ],
        out_specs=(out_spec, out_spec, out_spec),
        compiler_params=pltpu.CompilerParams(
            dimension_semantics=("parallel", "parallel"),
            vmem_limit_bytes=32 * 1024 * 1024),
    )(x, t)

    # Tiny finalization on (B, num_tiles, C, 1) arrays: global sums, dice
    # formula, class weights, divide by n_classes.
    I = jnp.sum(intersect, axis=(0, 1))[:, 0]        # (C,)
    Y = jnp.sum(y_sum, axis=(0, 1))[:, 0]
    Z = jnp.sum(z_sum, axis=(0, 1))[:, 0]
    dice = 1.0 - (2.0 * I + _SMOOTH) / (Z + Y + _SMOOTH)
    return jnp.sum(dice * w) / jnp.float32(C)


def dice_loss_ref(inputs, target, weight=None, softmax=False):
    """Pure-JAX port of the PyTorch DiceLoss.forward (ground truth)."""
    B, C, H, W = inputs.shape
    if softmax:
        inputs = jax.nn.softmax(inputs, axis=1)
    onehot = jnp.concatenate(
        [(target == i).astype(jnp.float32) for i in range(C)], axis=1)
    if weight is None:
        weight = [1.0] * C
    loss = 0.0
    for i in range(C):
        score = inputs[:, i].astype(jnp.float32)
        tgt = onehot[:, i]
        intersect = jnp.sum(score * tgt)
        y_sum = jnp.sum(tgt * tgt)
        z_sum = jnp.sum(score * score)
        d = 1.0 - (2.0 * intersect + _SMOOTH) / (z_sum + y_sum + _SMOOTH)
        loss = loss + d * weight[i]
    return loss / C


if __name__ == "__main__":
    key = jax.random.PRNGKey(0)
    k1, k2, k3, k4 = jax.random.split(key, 4)

    # --- check 1: fused in-kernel softmax, single full tile, default weights ---
    B, C, H, W = 2, 4, 16, 16
    logits = jax.random.normal(k1, (B, C, H, W), dtype=jnp.float32)
    target = jax.random.randint(k2, (B, 1, H, W), 0, C, dtype=jnp.int32)

    out1 = jax.block_until_ready(dice_loss(logits, target, softmax=True))
    ref1 = dice_loss_ref(logits, target, softmax=True)
    assert jnp.allclose(out1, ref1, atol=1e-5, rtol=1e-4), (out1, ref1)

    # --- check 2: multi-tile pixel grid + ragged-edge masking + class weights ---
    B2, C2, H2, W2 = 2, 4, 50, 50        # HW=2500; tile_len=1024 -> 3 tiles, partial tail
    probs = jax.nn.softmax(
        jax.random.normal(k3, (B2, C2, H2, W2), dtype=jnp.float32), axis=1)
    target2 = jax.random.randint(k4, (B2, 1, H2, W2), 0, C2, dtype=jnp.int32)
    wts = [1.0, 2.0, 0.5, 1.5]

    out2 = jax.block_until_ready(
        dice_loss(probs, target2, weight=wts, max_tile_len=1024))
    ref2 = dice_loss_ref(probs, target2, weight=wts)
    assert jnp.allclose(out2, ref2, atol=1e-5, rtol=1e-4), (out2, ref2)

    print("KERNEL_OK")
</pallas_src>

<mosaic_0001>
module attributes {stable_mosaic.version = 11 : i64} {
  func.func @_dice_partial_kernel(%arg0: i32, %arg1: i32, %arg2: memref<1x4x256xf32, #tpu.memory_space<vmem>>, %arg3: memref<1x1x256xi32, #tpu.memory_space<vmem>>, %arg4: memref<1x1x4x1xf32, #tpu.memory_space<vmem>>, %arg5: memref<1x1x4x1xf32, #tpu.memory_space<vmem>>, %arg6: memref<1x1x4x1xf32, #tpu.memory_space<vmem>>) attributes {dimension_semantics = [#tpu.dimension_semantics<parallel>, #tpu.dimension_semantics<parallel>], iteration_bounds = array<i64: 2, 1>, scalar_prefetch = 0 : i64, scratch_operands = 0 : i64, tpu.core_type = #tpu.core_type<tc>, window_params = [{transform_indices = @transform_0, window_bounds = array<i64: 1, 4, 256>}, {transform_indices = @transform_1, window_bounds = array<i64: 1, 1, 256>}, {transform_indices = @transform_2, window_bounds = array<i64: 1, 1, 4, 1>}, {transform_indices = @transform_3, window_bounds = array<i64: 1, 1, 4, 1>}, {transform_indices = @transform_4, window_bounds = array<i64: 1, 1, 4, 1>}]} {
    %c0 = arith.constant 0 : index
    %c0_0 = arith.constant 0 : index
    %c0_1 = arith.constant 0 : index
    %0 = vector.load %arg2[%c0, %c0_0, %c0_1] : memref<1x4x256xf32, #tpu.memory_space<vmem>>, vector<1x4x256xf32>
    %1 = vector.shape_cast %0 : vector<1x4x256xf32> to vector<4x256xf32>
    %cst = arith.constant dense<0xFF800000> : vector<256xf32>
    %2 = vector.multi_reduction <maximumf>, %1, %cst [0] : vector<4x256xf32> to vector<256xf32>
    %3 = vector.shape_cast %2 : vector<256xf32> to vector<1x256xf32>
    %4 = vector.broadcast %3 : vector<1x256xf32> to vector<4x256xf32>
    %5 = arith.subf %1, %4 : vector<4x256xf32>
    %6 = math.exp %5 : vector<4x256xf32>
    %cst_2 = arith.constant dense<0.000000e+00> : vector<256xf32>
    %7 = vector.multi_reduction <add>, %6, %cst_2 [0] : vector<4x256xf32> to vector<256xf32>
    %8 = vector.shape_cast %7 : vector<256xf32> to vector<1x256xf32>
    %9 = vector.broadcast %8 : vector<1x256xf32> to vector<4x256xf32>
    %10 = arith.divf %6, %9 : vector<4x256xf32>
    %c0_3 = arith.constant 0 : index
    %c0_4 = arith.constant 0 : index
    %c0_5 = arith.constant 0 : index
    %11 = vector.load %arg3[%c0_3, %c0_4, %c0_5] : memref<1x1x256xi32, #tpu.memory_space<vmem>>, vector<1x1x256xi32>
    %12 = vector.shape_cast %11 : vector<1x1x256xi32> to vector<1x256xi32>
    %13 = tpu.iota {dimensions = array<i32: 0>} : vector<4x256xi32>
    %14 = vector.broadcast %12 : vector<1x256xi32> to vector<4x256xi32>
    %15 = arith.cmpi eq, %14, %13 : vector<4x256xi32>
    %16 = arith.extui %15 : vector<4x256xi1> to vector<4x256xi32>
    %17 = arith.sitofp %16 : vector<4x256xi32> to vector<4x256xf32>
    %18 = arith.mulf %10, %17 : vector<4x256xf32>
    %cst_6 = arith.constant dense<0.000000e+00> : vector<4xf32>
    %19 = vector.multi_reduction <add>, %18, %cst_6 [1] : vector<4x256xf32> to vector<4xf32>
    %20 = vector.shape_cast %19 : vector<4xf32> to vector<4x1xf32>
    %c0_7 = arith.constant 0 : index
    %c0_8 = arith.constant 0 : index
    %c0_9 = arith.constant 0 : index
    %c0_10 = arith.constant 0 : index
    %21 = vector.load %arg4[%c0_7, %c0_8, %c0_9, %c0_10] : memref<1x1x4x1xf32, #tpu.memory_space<vmem>>, vector<1x1x4x1xf32>
    %22 = vector.shape_cast %21 : vector<1x1x4x1xf32> to vector<4x1xf32>
    %23 = vector.shape_cast %20 : vector<4x1xf32> to vector<1x1x4x1xf32>
    tpu.vector_store %arg4[%c0_7, %c0_8, %c0_9, %c0_10], %23 {strides = array<i32>} : memref<1x1x4x1xf32, #tpu.memory_space<vmem>>, vector<1x1x4x1xf32>,
    %cst_11 = arith.constant dense<0.000000e+00> : vector<4xf32>
    %24 = vector.multi_reduction <add>, %17, %cst_11 [1] : vector<4x256xf32> to vector<4xf32>
    %25 = vector.shape_cast %24 : vector<4xf32> to vector<4x1xf32>
    %c0_12 = arith.constant 0 : index
    %c0_13 = arith.constant 0 : index
    %c0_14 = arith.constant 0 : index
    %c0_15 = arith.constant 0 : index
    %26 = vector.load %arg5[%c0_12, %c0_13, %c0_14, %c0_15] : memref<1x1x4x1xf32, #tpu.memory_space<vmem>>, vector<1x1x4x1xf32>
    %27 = vector.shape_cast %26 : vector<1x1x4x1xf32> to vector<4x1xf32>
    %28 = vector.shape_cast %25 : vector<4x1xf32> to vector<1x1x4x1xf32>
    tpu.vector_store %arg5[%c0_12, %c0_13, %c0_14, %c0_15], %28 {strides = array<i32>} : memref<1x1x4x1xf32, #tpu.memory_space<vmem>>, vector<1x1x4x1xf32>,
    %29 = arith.mulf %10, %10 : vector<4x256xf32>
    %cst_16 = arith.constant dense<0.000000e+00> : vector<4xf32>
    %30 = vector.multi_reduction <add>, %29, %cst_16 [1] : vector<4x256xf32> to vector<4xf32>
    %31 = vector.shape_cast %30 : vector<4xf32> to vector<4x1xf32>
    %c0_17 = arith.constant 0 : index
    %c0_18 = arith.constant 0 : index
    %c0_19 = arith.constant 0 : index
    %c0_20 = arith.constant 0 : index
    %32 = vector.load %arg6[%c0_17, %c0_18, %c0_19, %c0_20] : memref<1x1x4x1xf32, #tpu.memory_space<vmem>>, vector<1x1x4x1xf32>
    %33 = vector.shape_cast %32 : vector<1x1x4x1xf32> to vector<4x1xf32>
    %34 = vector.shape_cast %31 : vector<4x1xf32> to vector<1x1x4x1xf32>
    tpu.vector_store %arg6[%c0_17, %c0_18, %c0_19, %c0_20], %34 {strides = array<i32>} : memref<1x1x4x1xf32, #tpu.memory_space<vmem>>, vector<1x1x4x1xf32>,
    return
  }
  func.func @transform_0(%arg0: i32, %arg1: i32) -> (i32, i32, i32) {
    %c0_i32 = arith.constant 0 : i32
    %c0_i32_0 = arith.constant 0 : i32
    return %arg0, %c0_i32, %arg1 : i32, i32, i32
  }
  func.func @transform_1(%arg0: i32, %arg1: i32) -> (i32, i32, i32) {
    %c0_i32 = arith.constant 0 : i32
    %c0_i32_0 = arith.constant 0 : i32
    return %arg0, %c0_i32, %arg1 : i32, i32, i32
  }
  func.func @transform_2(%arg0: i32, %arg1: i32) -> (i32, i32, i32, i32) {
    %c0_i32 = arith.constant 0 : i32
    %c0_i32_0 = arith.constant 0 : i32
    %c0_i32_1 = arith.constant 0 : i32
    return %arg0, %arg1, %c0_i32, %c0_i32_0 : i32, i32, i32, i32
  }
  func.func @transform_3(%arg0: i32, %arg1: i32) -> (i32, i32, i32, i32) {
    %c0_i32 = arith.constant 0 : i32
    %c0_i32_0 = arith.constant 0 : i32
    %c0_i32_1 = arith.constant 0 : i32
    return %arg0, %arg1, %c0_i32, %c0_i32_0 : i32, i32, i32, i32
  }
  func.func @transform_4(%arg0: i32, %arg1: i32) -> (i32, i32, i32, i32) {
    %c0_i32 = arith.constant 0 : i32
    %c0_i32_0 = arith.constant 0 : i32
    %c0_i32_1 = arith.constant 0 : i32
    return %arg0, %arg1, %c0_i32, %c0_i32_0 : i32, i32, i32, i32
  }
}

</mosaic_0001>

<bundles_post_ra>
// kernel: tpu_custom_call.1
= control target key start
LH: loop header
LB: loop body
LE: loop exit
PB: predicated region body
PF: predicated region fallthrough
CT: control target
= control target key end

     0   :  { %10 = vsyncpa [#allocation3], 0  ;;  %s1027_s0 = inlined_call_operand.hbm [shape: f32[2,4,256], index: 0, kind: input, shape index: {}]   ;;  %s1028_s1 = inlined_call_operand.hbm [shape: s32[2,1,256], index: 1, kind: input, shape index: {}]   ;;  %s1029_s2 = inlined_call_operand.vmem [shape: f32[2,1,4,1], index: 2, kind: output, shape index: {0}]   ;;  %s1030_s3 = inlined_call_operand.vmem [shape: f32[2,1,4,1], index: 3, kind: output, shape index: {1}]   ;;  %s1031_s4 = inlined_call_operand.vmem [shape: f32[2,1,4,1], index: 4, kind: output, shape index: {2}]  }
   0x1   :  { %12 = vsyncpa [#allocation3 + $0x1], 0 }
   0x2   :  { %13 = vsyncpa [#allocation5], 0 }
   0x3   :  { %15 = vsyncpa [#allocation5 + $0x1], 0  ;;  %s842_s15 = smov 0   ;;  %s844_s16 = smov 0  }
   0x4   :  { %s846_s17 = smov 0   ;;  %s848_s18 = smov 0  }
   0x5   :  { %s850_s19 = smov 0   ;;  %s852_s20 = smov 0  }
   0x6 LB: > { %s610_s21 = sadd.s32 4294967295, %s812_s20   ;;  %s33_s22 = sadd.s32 1, %s808_s19  ;;  %s812_s20 = sphi %s852_s20, %s21_s20   ;;  %s808_s19 = sphi %s850_s19, %s1045_s19   ;;  %s804_s18 = sphi %s848_s18, %s1044_s18   ;;  %s800_s17 = sphi %s846_s17, %s1043_s17   ;;  %s796_s16 = sphi %s844_s16, %s1042_s16   ;;  %s792_s15 = sphi %s842_s15, %s1041_s15  }
   0x7   : > { %p35_p0 = scmp.ge.s32.totalorder %s33_s22, 2  ;;  %s42_s23 = sadd.s32 1, %s800_s17 }
   0x8   : > { %p49_p1 = scmp.ne.s32.totalorder %s800_s17, %s796_s16  ;;  %p50_p2 = scmp.eq.s32.totalorder %s812_s20, 0 }
   0x9   : > { %s1047_s22 = smov (%p35_p0, %s33_s22), 0  ;;  %p55_p4 = scmp.ne.s32.totalorder %s796_s16, %s792_s15 }
   0xa   : > { %p878_p3 = por %p50_p2, %p49_p1  ;;  %s37_s25 = ssub.s32 %s808_s19, %s1047_s22 }
   0xb   : > { %p56_p5 = scmp.eq.s32.totalorder %s610_s21, 0  ;;  %p40_p6 = scmp.eq.s32.totalorder %s37_s25, 0 }
   0xc   : > { %p643_p8 = scmp.lt.s32.totalorder %s812_s20, 2  ;;  %s894_s28 = sand.u32 1, %s800_s17  }
   0xd   : > { %p885_p7 = por %p56_p5, %p55_p4  ;;  %s630_s29 = sshll.u32 %s808_s19, 7 }
   0xe   : > { %s891_s27 = scalar_select %p40_p6, %s800_s17, %s42_s23  }
   0xf   : > { %s1034_s26 = scalar_select %p885_p7, 1, 0 }
  0x10   : > { %s614_s30 = sshll.u32 %s894_s28, 3  ;;  %s901_s7 = scalar_lea.hbm %s1027_s0, %s630_s29 }
  0x11   : > { %s195_s8 = scalar_lea.vmem [#allocation2], %s614_s30  ;;  %p905_p9 = pnand %p643_p8, %p878_p3 }
  0x12   : > { %s205_s9 = sshll.u32 %s195_s8, 4  ;;  %s192_s11 = scalar_lea.sflag [#allocation3], %s894_s28  ;;  %s909_s9 = int_to_ptr.vmem [resolvable:$true] %s205_s9 }
  0x13   : > { %s698_s12 = scalar_lea.hbm %s901_s7, 128  ;;  %p700_p13 = pneg %p905_p9 }
  0x14   : > { %p699_p12 = scmp.ne.s32.totalorder %s901_s7, %s698_s12  ;;  %s703_s15 = scalar_lea.hbm %s1027_s0, 256 }
  0x15   : > { %p704_p2 = scmp.lt.u32.totalorder %s901_s7, %s1027_s0  ;;  %p705_p3 = scmp.lt.u32.totalorder %s703_s15, %s698_s12 }
  0x16   : > { %p701_p0 = pnand %p700_p13, %p699_p12  ;;  %p707_p5 = scmp.lt.u32.totalorder %s698_s12, %s901_s7 }
  0x17   : > { %p706_p4 = por %p705_p3, %p704_p2 }
  0x18   : > { %p702_p1 = pneg %p701_p0 }
  0x19   : > { %p708_p6 = por %p707_p5, %p706_p4 }
  0x1b   : > { %p709_p8 = pnand %p708_p6, %p702_p1 }
  0x1d   : > { %712 = shalt.err (!%p709_p8)
}
  0x1e   : > { %s713_s24 = scalar_lea.vmem %s909_s9, 128  ;;  %s814_s25 = smov [#allocation2]  }
  0x1f   : > { %p714_p12 = scmp.ne.s32.totalorder %s909_s9, %s713_s24  ;;  %s718_s29 = sshll.u32 %s814_s25, 4  ;;  %s719_s29 = int_to_ptr.vmem [resolvable:$false] %s718_s29 }
  0x20   : > { %s720_s30 = scalar_lea.vmem %s719_s29, 256  ;;  %p721_p11 = scmp.lt.s32.totalorder %s909_s9, %s719_s29 }
  0x21   : > { %p716_p0 = pnand %p714_p12, %p700_p13  ;;  %p722_p2 = scmp.lt.s32.totalorder %s720_s30, %s713_s24 }
  0x23   : > { %p717_p10 = pneg %p716_p0  ;;  %p723_p3 = por %p722_p2, %p721_p11 }
  0x25   : > { %p724_p4 = pnand %p723_p3, %p717_p10 }
  0x27   : > { %727 = shalt.err (!%p724_p4)
}
  0x28   : > { %639 = dma.hbm_to_vmem [thread:$0]  (!%p905_p9), %s901_s7, 128, %s909_s9, %s192_s11  }
  0x29   : > { %p1036_p1 = scmp.lt.s32.totalorder %s812_s20, 3  ;;  %p1037_p5 = scmp.ge.s32.totalorder %s812_s20, 1 }
  0x2a   : > { %s617_s6 = sshll.u32 %s894_s28, 1  ;;  %s631_s8 = sshll.u32 %s808_s19, 5 }
  0x2b   : > { %p943_p6 = pnand %p1037_p5, %p1036_p1  ;;  %s952_s14 = scalar_lea.hbm %s1028_s1, %s631_s8 }
  0x2c   : > { %s216_s15 = scalar_lea.vmem [#allocation4], %s617_s6  ;;  %s213_s7 = scalar_lea.sflag [#allocation5], %s894_s28 }
  0x2d   : > { %s1038_s5 = scalar_select %p943_p6, 1, 0 }
  0x2e   : > { %s226_s21 = sshll.u32 %s216_s15, 4  ;;  %s728_s9 = scalar_lea.hbm %s952_s14, 32  ;;  %s227_s21 = int_to_ptr.vmem [resolvable:$true] %s226_s21 }
  0x2f   : > { %p729_p10 = scmp.ne.s32.totalorder %s952_s14, %s728_s9  ;;  %s733_s24 = scalar_lea.hbm %s1028_s1, 64 }
  0x30   : > { %p734_p12 = scmp.lt.u32.totalorder %s952_s14, %s1028_s1  ;;  %p735_p0 = scmp.lt.u32.totalorder %s733_s24, %s728_s9 }
  0x31   : > { %p731_p11 = pnand %p729_p10, %p700_p13  ;;  %p737_p3 = scmp.lt.u32.totalorder %s728_s9, %s952_s14 }
  0x32   : > { %p736_p2 = por %p735_p0, %p734_p12 }
  0x33   : > { %p732_p8 = pneg %p731_p11 }
  0x34   : > { %p738_p4 = por %p737_p3, %p736_p2 }
  0x36   : > { %p739_p1 = pnand %p738_p4, %p732_p8 }
  0x38   : > { %742 = shalt.err (!%p739_p1)
}
  0x39   : > { %s743_s28 = scalar_lea.vmem %s227_s21, 32  ;;  %s815_s30 = smov [#allocation4]  }
  0x3a   : > { %p744_p5 = scmp.ne.s32.totalorder %s227_s21, %s743_s28  ;;  %s748_s6 = sshll.u32 %s815_s30, 4  ;;  %s749_s6 = int_to_ptr.vmem [resolvable:$false] %s748_s6 }
  0x3b   : > { %s750_s8 = scalar_lea.vmem %s749_s6, 64  ;;  %p751_p7 = scmp.lt.s32.totalorder %s227_s21, %s749_s6 }
  0x3c   : > { %p746_p10 = pnand %p744_p5, %p700_p13  ;;  %p752_p6 = scmp.lt.s32.totalorder %s750_s8, %s743_s28 }
  0x3e   : > { %p747_p11 = pneg %p746_p10  ;;  %p753_p0 = por %p752_p6, %p751_p7 }
  0x40   : > { %p754_p12 = pnand %p753_p0, %p747_p11 }
  0x42   : > { %757 = shalt.err (!%p754_p12)
}
  0x43   : > { %642 = dma.hbm_to_vmem [thread:$0]  (!%p905_p9), %s952_s14, 32, %s227_s21, %s213_s7  }
  0x44   : > { %p1039_p8 = scmp.ne.s32.totalorder %s1038_s5, 0 }
  0x45   : > { %s237_s12 = sand.u32 (!%p1039_p8), 1, %s796_s16   ;;  %p1040_p13 = scmp.ne.s32.totalorder (!%p1039_p8), %s1034_s26, 0 }
  0x46   : > { %235 = sbr.rel (%p1039_p8) target bundleno = 298 (0x12a), region = 28  ;;  %s621_s13 = sshll.u32 (!%p1039_p8), %s237_s12, 3 }
  0x47   : > { %s238_s15 = scalar_lea.sflag (!%p1039_p8), [#allocation3], %s237_s12  ;;  %s241_s9 = scalar_lea.vmem (!%p1039_p8), [#allocation2], %s621_s13 }
  0x4d   : > { %783 = dma.done.wait (%p1040_p13), %s238_s15, 128  }
  0x4e   : > { %785 = vsyncadd (%p1040_p13), %s238_s15, 4294967168  ;;  %s622_s11 = sshll.u32 %s237_s12, 1  ;;  %s247_s23 = scalar_lea.sflag [#allocation5], %s237_s12 }
  0x4f   : > { %s981_s10 = scalar_lea.vmem [#allocation4], %s622_s11 }
  0x50   : > { %787 = dma.done.wait (%p1040_p13), %s247_s23, 32  }
  0x51   : > { %789 = vsyncadd (%p1040_p13), %s247_s23, 4294967264  ;;  %vm323_vm0 = vcmask 1043456   ;;  %v319_v0 = vld [vmem:[%s241_s9] sm:$0xff]  ;;  %v369_v26 = vlaneseq  ;;  %v368_v39 = vld [vmem:[%s981_s10] sm:$0x3]  ;;  %v816_v43 = vmov 0.0  }
  0x52   : > { %v321_v1 = vcombine.high %v319_v0, %v319_v0  ;;  %v324_v2 = vsel %vm323_vm0, %v319_v0, -inf  ;;  %p298_p7 = scmp.lt.s32.totalorder %s804_s18, 1  ;;  %vm398_vm3 = vcmask 3072  }
  0x53   : > { %v325_v3 = vrot.slane %v324_v2, 4  ;;  %v370_v31 = vshrl.u32 %v369_v26, 7 }
  0x54   : > { %v331_v4 = vsel %vm323_vm0, %v321_v1, -inf  ;;  %s1049_s18 = smov (!%p298_p7, %s804_s18), 1 }
  0x55   : > { %v326_v5 = vmax.f32 %v324_v2, %v325_v3  ;;  %v332_v6 = vrot.slane %v331_v4, 4  ;;  %v373_v36 = vsub.s32 0, %v370_v31  ;;  %v377_v37 = vsub.s32 1, %v370_v31  ;;  %s623_s26 = sshll.u32 %s1049_s18, 2 }
  0x56   : > { %s304_s21 = scalar_lea.vmem %s1029_s2, %s623_s26  ;;  %s318_s25 = scalar_lea.vmem %s1031_s4, %s623_s26 }
  0x57   : > { %v327_v7 = vrot.slane %v326_v5, 2  ;;  %v333_v8 = vmax.f32 %v331_v4, %v332_v6  ;;  %v374_v41 = vrot.slane %v368_v39, %v373_v36  ;;  %v378_v42 = vrot.slane %v368_v39, %v377_v37  ;;  %s311_s30 = scalar_lea.vmem %s1030_s3, %s623_s26 }
  0x59   : > { %v328_v9 = vmax.f32 %v326_v5, %v327_v7  ;;  %v334_v10 = vrot.slane %v333_v8, 2  ;;  %vm379_vm1 = vcmp.eq.s32.totalorder %v374_v41, %v370_v31  ;;  %vm380_vm2 = vcmp.eq.s32.totalorder %v378_v42, %v370_v31 }
  0x5a   : > { %v626_v44 = vsel %vm379_vm1, 1.0, %v816_v43  ;;  %v627_v45 = vsel %vm380_vm2, 1.0, %v816_v43 }
  0x5b   : > { %v329_v11 = vrot.slane %v328_v9, 1  ;;  %v335_v12 = vmax.f32 %v333_v8, %v334_v10  ;;  %v387_v46 = vcombine.low %v626_v44, %v627_v45  ;;  %v400_v57 = vsel %vm323_vm0, %v626_v44, 0.0 }
  0x5c   : > { %v401_v58 = vsel %vm323_vm0, %v627_v45, 0.0 }
  0x5d   : > { %v330_v13 = vmax.f32 %v328_v9, %v329_v11  ;;  %v336_v14 = vrot.slane %v335_v12, 1  ;;  %v402_v61 = vadd.f32 %v401_v58, %v400_v57 }
  0x5f   : > { %v337_v15 = vmax.f32 %v335_v12, %v336_v14 }
  0x61   : > { %v340_v16 = vcombine.low %v330_v13, %v337_v15 }
  0x63   : > { %v342_v17 = vsub.f32 %v319_v0, %v340_v16 }
  0x65   : > { %v343_v18 = vmul.f32 1.442695, %v342_v17 }
  0x67   : > { %694 = vpow2.f32 %v343_v18 }
  0x71   : > { %v695_v19 = vpop.eup %694 }
  0x72   : > { %v346_v20 = vcombine.high %v695_v19, %v695_v19  ;;  %v348_v21 = vsel %vm323_vm0, %v695_v19, 0.0 }
  0x73   : > { %v349_v22 = vrot.slane %v348_v21, 4 }
  0x74   : > { %v355_v23 = vsel %vm323_vm0, %v346_v20, 0.0 }
  0x75   : > { %v350_v24 = vadd.f32 %v349_v22, %v348_v21  ;;  %v356_v25 = vrot.slane %v355_v23, 4 }
  0x77   : > { %v351_v27 = vrot.slane %v350_v24, 2  ;;  %v357_v28 = vadd.f32 %v356_v25, %v355_v23 }
  0x79   : > { %v352_v29 = vadd.f32 %v351_v27, %v350_v24  ;;  %v358_v30 = vrot.slane %v357_v28, 2 }
  0x7b   : > { %v353_v32 = vrot.slane %v352_v29, 1  ;;  %v359_v33 = vadd.f32 %v358_v30, %v357_v28 }
  0x7d   : > { %v354_v34 = vadd.f32 %v353_v32, %v352_v29  ;;  %v360_v35 = vrot.slane %v359_v33, 1 }
  0x7f   : > { %v361_v38 = vadd.f32 %v360_v35, %v359_v33 }
  0x81   : > { %v364_v40 = vcombine.low %v354_v34, %v361_v38 }
  0x83   : > { %696 = vrcp.f32 %v364_v40 }
  0x8d   : > { %v697_v47 = vpop.eup %696 }
  0x8e   : > { %v367_v48 = vmul.f32 %v697_v47, %v695_v19 }
  0x90   : > { %v389_v49 = vmul.f32 %v387_v46, %v367_v48  ;;  %v406_v50 = vmul.f32 %v367_v48, %v367_v48 }
  0x92   : > { %v391_v51 = vcombine.high %v389_v49, %v389_v49  ;;  %v393_v52 = vsel %vm323_vm0, %v389_v49, 0.0  ;;  %v408_v53 = vcombine.high %v406_v50, %v406_v50  ;;  %v410_v54 = vsel %vm323_vm0, %v406_v50, 0.0 }
  0x94   : > { %v394_v55 = vsel %vm323_vm0, %v391_v51, 0.0  ;;  %v411_v56 = vsel %vm323_vm0, %v408_v53, 0.0 }
  0x95   : > { %v395_v59 = vadd.f32 %v394_v55, %v393_v52  ;;  %v412_v60 = vadd.f32 %v411_v56, %v410_v54 }
  0x97   : > { %396 = vadd.xlane.f32.xlu0 %v395_v59  ;;  %413 = vadd.xlane.f32.xlu1 %v412_v60 }
  0x9b   : > { %403 = vadd.xlane.f32.xlu0 %v402_v61 }
 0x124   : > { %v397_v62 = vpop.xlane.xlu0 %396  ;;  %v414_v63 = vpop.xlane.xlu1 %413 }
 0x125   : > { %399 = vst.msk [vmem:[%s304_s21] sm:$0xf] %vm398_vm3, %v397_v62  ;;  %415 = vst.msk [vmem:[%s318_s25] sm:$0xf] %vm398_vm3, %v414_v63 }
 0x128   : > { %v404_v0 = vpop.xlane.xlu0 %403 }
 0x129   : > { %405 = vst.msk [vmem:[%s311_s30] sm:$0xf] %vm398_vm3, %v404_v0 }
 0x12a PF: > { %s21_s20 = sadd.s32 1, %s812_s20   ;;  %s1041_s15 = smov %s796_s16 }
 0x12b   : > { %p18_p9 = scmp.ge.s32.totalorder %s21_s20, 4   ;;  %s1042_s16 = smov %s800_s17 }
 0x12c   : > { %s1043_s17 = smov %s891_s27  ;;  %s1044_s18 = smov %s808_s19 }
 0x12d   : > { %s1045_s19 = smov %s1047_s22  ;;  %20 = sbr.rel (!%p18_p9) target bundleno = 6 (0x6), region = 105 }
 0x134   :  { %481 = vsyncpa [#allocation3], 1 }
 0x135   :  { %483 = vsyncpa [#allocation3 + $0x1], 1 }
 0x136   :  { %484 = vsyncpa [#allocation5], 1 }
 0x137   :  { %486 = vsyncpa [#allocation5 + $0x1], 1 }

</bundles_post_ra>
